<compile_context>
chip_gen: v7x
topology: tpu7x:2x2x1
jax: 0.10.0
libtpu: 0.0.40
codegen_flags: <defaults>
</compile_context>

<pallas_src>
import jax
import jax.numpy as jnp
import numpy as np
from jax.experimental import pallas as pl
from jax.experimental.pallas import tpu as pltpu

EPS = 1e-5  # nn.BatchNorm1d default eps


def convblock_kernel(xcol_ref, w_ref, g_ref, b_ref, o_ref):
    """Fused conv-as-matmul + BatchNorm1d (training batch stats) + ReLU for one C_out tile.

    xcol_ref: (K*C_in, N*L)  im2col'd input (compute dtype); same block every grid step
    w_ref:    (TC, K*C_in)   conv weights for this channel tile (compute dtype)
    g_ref:    (TC, 1)        BN gamma (f32)
    b_ref:    (TC, 1)        BN beta  (f32)
    o_ref:    (TC, N*L)      output tile (f32), lane-dense
    """
    # Single MXU contraction over C_in*K, f32 accumulation.
    acc = jnp.dot(w_ref[...], xcol_ref[...], preferred_element_type=jnp.float32)

    # Single-pass per-channel batch stats over the merged (N*L) lane axis.
    nl = acc.shape[1]
    inv_n = jnp.float32(1.0 / nl)
    mean = jnp.sum(acc, axis=1, keepdims=True) * inv_n
    ex2 = jnp.sum(acc * acc, axis=1, keepdims=True) * inv_n
    var = ex2 - mean * mean  # biased variance == PyTorch training-mode normalization

    # Fold gamma / beta / mean / var into one per-channel scale + shift.
    # (Conv bias is omitted entirely: training-mode BN mean subtraction cancels it exactly.)
    scale = g_ref[...] * jax.lax.rsqrt(var + EPS)
    shift = b_ref[...] - mean * scale

    o_ref[...] = jnp.maximum(acc * scale + shift, 0.0).astype(o_ref.dtype)


def _im2col_1d(x, K, left):
    """(N, C_in, L) -> (K*C_in, N*L) with 'same' zero padding; rows ordered tap-major (k*C_in+c)."""
    N, C_in, L = x.shape
    right = K - 1 - left
    x_pad = jnp.pad(x, ((0, 0), (0, 0), (left, right)))        # (N, C_in, L+K-1)
    taps = [x_pad[:, :, k:k + L] for k in range(K)]             # each (N, C_in, L)
    xcol = jnp.stack(taps, axis=0)                              # (K, N, C_in, L)
    xcol = jnp.transpose(xcol, (0, 2, 1, 3))                    # (K, C_in, N, L)
    return xcol.reshape(K * C_in, N * L)


def conv_block(x, weight, bias, gamma, beta, *, stride=1, dilation=1,
               compute_dtype=jnp.float32, channel_tile=8):
    """ConvBlock forward. x: (N, C_in, L) float32. Returns (N, C_out, L) float32."""
    del bias  # exactly cancelled by training-mode BatchNorm mean subtraction
    N, C_in, L = x.shape
    C_out, _, K = weight.shape
    # TODO(synk): stride>1 / dilation>1 would need strided im2col columns and a shorter output L.
    assert stride == 1 and dilation == 1, "kernel supports stride=1, dilation=1"

    # Replicate conv1d_same_padding's padding math: extra pad (when odd) goes on the right.
    padding = (L - 1) * stride - L + dilation * (K - 1) + 1
    left = padding // 2

    NL = N * L
    # Channel tile: 8 sublanes when it divides C_out, else one full-extent tile (always legal).
    tc = channel_tile if (channel_tile <= C_out and C_out % channel_tile == 0) else C_out

    xcol = _im2col_1d(x, K, left).astype(compute_dtype)                          # (K*C_in, N*L)
    w2d = jnp.transpose(weight, (0, 2, 1)).reshape(C_out, K * C_in).astype(compute_dtype)
    g2d = gamma.reshape(C_out, 1).astype(jnp.float32)
    b2d = beta.reshape(C_out, 1).astype(jnp.float32)

    out2d = pl.pallas_call(
        convblock_kernel,
        out_shape=jax.ShapeDtypeStruct((C_out, NL), jnp.float32),
        grid=(C_out // tc,),
        in_specs=[
            # im2col slab: constant block index -> DMA'd once, stays resident across grid steps.
            pl.BlockSpec((K * C_in, NL), lambda i: (0, 0)),
            pl.BlockSpec((tc, K * C_in), lambda i: (i, 0)),
            pl.BlockSpec((tc, 1), lambda i: (i, 0)),
            pl.BlockSpec((tc, 1), lambda i: (i, 0)),
        ],
        out_specs=pl.BlockSpec((tc, NL), lambda i: (i, 0)),
        compiler_params=pltpu.CompilerParams(
            dimension_semantics=("parallel",),       # megacore sharding of the C_out axis (v7x)
            vmem_limit_bytes=32 * 1024 * 1024,       # safe on v5e/v6e (128 MiB) and v7x (64 MiB)
        ),
    )(xcol, w2d, g2d, b2d)

    # Back to NCL only at the boundary.
    return out2d.reshape(C_out, N, L).transpose(1, 0, 2)


def conv_block_reference(x, weight, bias, gamma, beta, *, stride=1, dilation=1):
    """Plain-JAX reference (faithful to the PyTorch module, conv bias included)."""
    N, C_in, L = x.shape
    C_out, _, K = weight.shape
    padding = (L - 1) * stride - L + dilation * (K - 1) + 1
    left = padding // 2
    right = padding // 2 + (padding % 2)
    x_pad = jnp.pad(x, ((0, 0), (0, 0), (left, right)))
    y = jax.lax.conv_general_dilated(
        x_pad, weight, window_strides=(stride,), padding="VALID",
        rhs_dilation=(dilation,), dimension_numbers=("NCH", "OIH", "NCH"),
    )
    y = y + bias[None, :, None]
    mean = y.mean(axis=(0, 2), keepdims=True)
    var = ((y - mean) ** 2).mean(axis=(0, 2), keepdims=True)
    y = (y - mean) / jnp.sqrt(var + EPS)
    y = y * gamma[None, :, None] + beta[None, :, None]
    return jnp.maximum(y, 0.0)


if __name__ == "__main__":
    # ConvBlock(in_channels=4, out_channels=16, kernel_size=3, stride=1) on x of shape (2, 4, 64).
    # N*L = 128 -> lane-dense output blocks; C_out=16 with tile 8 -> a real 2-step parallel grid.
    N, C_in, C_out, L, K = 2, 4, 16, 64, 3

    key = jax.random.PRNGKey(0)
    kx, kw, kb, kg, kbt = jax.random.split(key, 5)
    x = jax.random.normal(kx, (N, C_in, L), dtype=jnp.float32)
    bound = 1.0 / np.sqrt(C_in * K)
    weight = jax.random.uniform(kw, (C_out, C_in, K), jnp.float32, -bound, bound)
    bias = jax.random.uniform(kb, (C_out,), jnp.float32, -bound, bound)
    # BN affine params (PyTorch defaults are ones/zeros; randomized here to exercise the fold).
    gamma = jax.random.uniform(kg, (C_out,), jnp.float32, 0.5, 1.5)
    beta = 0.1 * jax.random.normal(kbt, (C_out,), jnp.float32)

    ref = jax.block_until_ready(conv_block_reference(x, weight, bias, gamma, beta, stride=1))

    # f32 path: strict check against the reference.
    out = jax.block_until_ready(conv_block(x, weight, bias, gamma, beta, stride=1))
    assert out.shape == (N, C_out, L)
    np.testing.assert_allclose(np.asarray(out), np.asarray(ref), rtol=1e-4, atol=1e-5)

    # bf16 MXU inputs with f32 accumulation + f32 BN/ReLU: looser tolerance.
    out_bf16 = jax.block_until_ready(
        conv_block(x, weight, bias, gamma, beta, stride=1, compute_dtype=jnp.bfloat16))
    np.testing.assert_allclose(np.asarray(out_bf16), np.asarray(ref), rtol=5e-2, atol=1e-1)

    print("KERNEL_OK")
</pallas_src>

<mosaic_0001>
module attributes {stable_mosaic.version = 11 : i64} {
  func.func @convblock_kernel(%arg0: i32, %arg1: memref<12x128xf32, #tpu.memory_space<vmem>>, %arg2: memref<8x12xf32, #tpu.memory_space<vmem>>, %arg3: memref<8x1xf32, #tpu.memory_space<vmem>>, %arg4: memref<8x1xf32, #tpu.memory_space<vmem>>, %arg5: memref<8x128xf32, #tpu.memory_space<vmem>>) attributes {dimension_semantics = [#tpu.dimension_semantics<parallel>], iteration_bounds = array<i64: 2>, scalar_prefetch = 0 : i64, scratch_operands = 0 : i64, tpu.core_type = #tpu.core_type<tc>, window_params = [{pipeline_mode = #tpu.pipeline_mode<synchronous>, transform_indices = @transform_0, window_bounds = array<i64: 12, 128>}, {transform_indices = @transform_1, window_bounds = array<i64: 8, 12>}, {transform_indices = @transform_2, window_bounds = array<i64: 8, 1>}, {transform_indices = @transform_3, window_bounds = array<i64: 8, 1>}, {transform_indices = @transform_4, window_bounds = array<i64: 8, 128>}]} {
    %c0 = arith.constant 0 : index
    %c0_0 = arith.constant 0 : index
    %0 = vector.load %arg2[%c0, %c0_0] : memref<8x12xf32, #tpu.memory_space<vmem>>, vector<8x12xf32>
    %c0_1 = arith.constant 0 : index
    %c0_2 = arith.constant 0 : index
    %1 = vector.load %arg1[%c0_1, %c0_2] : memref<12x128xf32, #tpu.memory_space<vmem>>, vector<12x128xf32>
    %cst = arith.constant dense<0.000000e+00> : vector<8x128xf32>
    %2 = tpu.matmul %0, %1, %cst {dimension_numbers = #tpu.dot_dimension_numbers<[1], [0], [0], [1], [0, 0, 1, 1], [], []>} : vector<8x12xf32>, vector<12x128xf32>, vector<8x128xf32> -> vector<8x128xf32>
    %cst_3 = arith.constant dense<0.000000e+00> : vector<8xf32>
    %3 = vector.multi_reduction <add>, %2, %cst_3 [1] : vector<8x128xf32> to vector<8xf32>
    %4 = vector.shape_cast %3 : vector<8xf32> to vector<8x1xf32>
    %cst_4 = arith.constant 7.812500e-03 : f32
    %5 = vector.broadcast %cst_4 : f32 to vector<8x1xf32>
    %6 = arith.mulf %4, %5 : vector<8x1xf32>
    %7 = arith.mulf %2, %2 : vector<8x128xf32>
    %cst_5 = arith.constant dense<0.000000e+00> : vector<8xf32>
    %8 = vector.multi_reduction <add>, %7, %cst_5 [1] : vector<8x128xf32> to vector<8xf32>
    %9 = vector.shape_cast %8 : vector<8xf32> to vector<8x1xf32>
    %cst_6 = arith.constant 7.812500e-03 : f32
    %10 = vector.broadcast %cst_6 : f32 to vector<8x1xf32>
    %11 = arith.mulf %9, %10 : vector<8x1xf32>
    %12 = arith.mulf %6, %6 : vector<8x1xf32>
    %13 = arith.subf %11, %12 : vector<8x1xf32>
    %c0_7 = arith.constant 0 : index
    %c0_8 = arith.constant 0 : index
    %14 = vector.load %arg3[%c0_7, %c0_8] : memref<8x1xf32, #tpu.memory_space<vmem>>, vector<8x1xf32>
    %cst_9 = arith.constant 9.99999974E-6 : f32
    %15 = vector.broadcast %cst_9 : f32 to vector<8x1xf32>
    %16 = arith.addf %13, %15 : vector<8x1xf32>
    %17 = math.rsqrt %16 : vector<8x1xf32>
    %18 = arith.mulf %14, %17 : vector<8x1xf32>
    %c0_10 = arith.constant 0 : index
    %c0_11 = arith.constant 0 : index
    %19 = vector.load %arg4[%c0_10, %c0_11] : memref<8x1xf32, #tpu.memory_space<vmem>>, vector<8x1xf32>
    %20 = arith.mulf %6, %18 : vector<8x1xf32>
    %21 = arith.subf %19, %20 : vector<8x1xf32>
    %22 = vector.broadcast %18 : vector<8x1xf32> to vector<8x128xf32>
    %23 = arith.mulf %2, %22 : vector<8x128xf32>
    %24 = vector.broadcast %21 : vector<8x1xf32> to vector<8x128xf32>
    %25 = arith.addf %23, %24 : vector<8x128xf32>
    %cst_12 = arith.constant 0.000000e+00 : f32
    %26 = vector.broadcast %cst_12 : f32 to vector<8x128xf32>
    %27 = arith.maximumf %25, %26 : vector<8x128xf32>
    %c0_13 = arith.constant 0 : index
    %c0_14 = arith.constant 0 : index
    %28 = vector.load %arg5[%c0_13, %c0_14] : memref<8x128xf32, #tpu.memory_space<vmem>>, vector<8x128xf32>
    tpu.vector_store %arg5[%c0_13, %c0_14], %27 {strides = array<i32>} : memref<8x128xf32, #tpu.memory_space<vmem>>, vector<8x128xf32>,
    return
  }
  func.func @transform_0(%arg0: i32) -> (i32, i32) {
    %c0_i32 = arith.constant 0 : i32
    %c0_i32_0 = arith.constant 0 : i32
    %c0_i32_1 = arith.constant 0 : i32
    return %c0_i32, %c0_i32_0 : i32, i32
  }
  func.func @transform_1(%arg0: i32) -> (i32, i32) {
    %c0_i32 = arith.constant 0 : i32
    %c0_i32_0 = arith.constant 0 : i32
    return %arg0, %c0_i32 : i32, i32
  }
  func.func @transform_2(%arg0: i32) -> (i32, i32) {
    %c0_i32 = arith.constant 0 : i32
    %c0_i32_0 = arith.constant 0 : i32
    return %arg0, %c0_i32 : i32, i32
  }
  func.func @transform_3(%arg0: i32) -> (i32, i32) {
    %c0_i32 = arith.constant 0 : i32
    %c0_i32_0 = arith.constant 0 : i32
    return %arg0, %c0_i32 : i32, i32
  }
  func.func @transform_4(%arg0: i32) -> (i32, i32) {
    %c0_i32 = arith.constant 0 : i32
    %c0_i32_0 = arith.constant 0 : i32
    return %arg0, %c0_i32 : i32, i32
  }
}

</mosaic_0001>

<bundles_post_ra>
// kernel: tpu_custom_call.1
= control target key start
LH: loop header
LB: loop body
LE: loop exit
PB: predicated region body
PF: predicated region fallthrough
CT: control target
= control target key end

     0   :  { %9 = vsyncpa [#allocation3], 0  ;;  %s718_s0 = inlined_call_operand.vmem [shape: f32[12,128], index: 0, kind: input, shape index: {}]   ;;  %s719_s1 = inlined_call_operand.vmem [shape: f32[16,12], index: 1, kind: input, shape index: {}]   ;;  %s720_s2 = inlined_call_operand.vmem [shape: f32[16,1], index: 2, kind: input, shape index: {}]   ;;  %s721_s3 = inlined_call_operand.vmem [shape: f32[16,1], index: 3, kind: input, shape index: {}]   ;;  %s722_s4 = inlined_call_operand.hbm [shape: f32[16,128], index: 4, kind: output, shape index: {}]  }
   0x1   :  { %11 = vsyncpa [#allocation3 + $0x1], 0  ;;  %s606_s15 = smov 0   ;;  %s608_s16 = smov 0  }
   0x2   :  { %s610_s17 = smov 0   ;;  %s612_s18 = smov 0  }
   0x3 LB: > { %s627_s19 = sadd.s32 4294967295, %s573_s18   ;;  %s435_s20 = sadd.s32 4294967294, %s573_s18   ;;  %s573_s18 = sphi %s612_s18, %s728_s18   ;;  %s569_s17 = sphi %s610_s17, %s727_s17   ;;  %s565_s16 = sphi %s608_s16, %s726_s16   ;;  %s561_s15 = sphi %s606_s15, %s725_s15  }
   0x4   : > { %s631_s21 = sadd.s32 1, %s573_s18   ;;  %s123_s22 = sadd.s32 1, %s569_s17 }
   0x5   : > { %s120_s23 = ssub.s32 %s573_s18, %s631_s21  ;;  %p133_p0 = scmp.ne.s32.totalorder %s569_s17, %s565_s16 }
   0x6   : > { %p121_p1 = scmp.eq.s32.totalorder %s120_s23, 0  ;;  %p134_p2 = scmp.eq.s32.totalorder %s627_s19, 1 }
   0x7   : > { %p139_p3 = scmp.ne.s32.totalorder %s565_s16, %s561_s15  ;;  %p140_p4 = scmp.eq.s32.totalorder %s435_s20, 1 }
   0x8   : > { %s642_s24 = scalar_select %p121_p1, %s569_s17, %s123_s22  }
   0x9   : > { %p644_p5 = por %p134_p2, %p133_p0  ;;  %p648_p6 = por %p140_p4, %p139_p3 }
   0xa   : > { %p438_p7 = scmp.ge.s32.totalorder %s573_s18, 1  ;;  %p182_p8 = scmp.lt.s32.totalorder %s573_s18, 3 }
   0xc   : > { %p183_p9 = pnand %p438_p7, %p182_p8 }
   0xd   : > { %v228_v0 = vld [vmem:[%s718_s0] sm:$0xff] (!%p183_p9)  ;;  %v229_v1 = vld [vmem:[%s718_s0 + $0x8] sm:$0xf] (!%p183_p9)  ;;  %vm234_vm0 = vcmask (!%p183_p9), 1043456   ;;  %v575_v2 = vmov (!%p183_p9), 0.0|0.0   ;;  %vm576_vm1 = vmmov (!%p183_p9), 1  }
   0xe   : > { %186 = sbr.rel (%p183_p9) target bundleno = 553 (0x229), region = 36  ;;  %459 = vmatprep.subr.bf16.mxu0 (!%p183_p9), %v575_v2  ;;  %v460_v3 = vpack.c.bf16 (!%p183_p9), %v229_v1, %v228_v0  ;;  %vm461_vm2 = vmpackc.low (!%p183_p9), %vm234_vm0, %vm576_vm1  ;;  %p215_p10 = scmp.lt.s32.totalorder (!%p183_p9), %s627_s19, 1  ;;  %vm577_vm3 = vmmov (!%p183_p9), 0   ;;  %v578_v4 = vmov (!%p183_p9), 0.0   ;;  %vm230_vm4 = vcmask (!%p183_p9), 97280  }
   0xf   : > { %456 = vmatprep.mubr.msk.f32.mxu0 (!%p183_p9), %vm577_vm3, %v578_v4  ;;  %v579_v9 = vmov (!%p183_p9), 0   ;;  %s212_s22 = sand.u32 (!%p183_p9), 1, %s565_s16   ;;  %s446_s27 = sshll.u32 (!%p183_p9), %s627_s19, 7 }
  0x10   : > { %462 = vmatpush3.bf16.msk.msra.mxu0 (!%p183_p9), %vm461_vm2, %v460_v3  ;;  %507 = vset.pattern.permute.xlu1 (!%p183_p9), %v579_v9  ;;  %s439_s23 = sshll.u32 (!%p183_p9), %s212_s22, 3  ;;  %s339_s7 = scalar_lea.sflag (!%p183_p9), [#allocation3], %s212_s22 }
  0x11   : > { %508 = vset.pattern.permute.xlu0 (!%p183_p9), %v579_v9  ;;  %s214_s28 = scalar_lea.vmem (!%p183_p9), [#allocation2], %s439_s23 }
  0x12   : > { %s352_s29 = sshll.u32 (!%p183_p9), %s214_s28, 4  ;;  %s678_s29 = int_to_ptr.vmem [resolvable:$true] %s352_s29 }
  0x13   : > { %s511_s8 = scalar_lea.vmem (!%p183_p9), %s678_s29, 128 }
  0x14   : > { %p512_p11 = scmp.ne.s32.totalorder (!%p183_p9), %s678_s29, %s511_s8 }
  0x15   : > { %s216_s5 = scalar_select %p215_p10, %s627_s19, 1 }
  0x16   : > { %p513_p12 = pnand %p512_p11, %p644_p5  ;;  %s580_s19 = smov [#allocation2]  }
  0x17   : > { %s440_s6 = sshll.u32 %s216_s5, 3 }
  0x18   : > { %s218_s9 = scalar_lea.vmem %s719_s1, %s440_s6  ;;  %s222_s12 = scalar_lea.vmem %s720_s2, %s440_s6 }
  0x19   : > { %v227_v5 = vld [vmem:[%s218_s9] sm:$0xff]  ;;  %s226_s20 = scalar_lea.vmem %s721_s3, %s440_s6  ;;  %s676_s6 = scalar_lea.hbm %s722_s4, %s446_s27 }
  0x1a   : > { %457 = vmatmul.mubr.msk.f32.vlgmr.msra.gmra.mrb[0].mxu0 %vm230_vm4, %v227_v5  ;;  %v317_v17 = vld [vmem:[%s222_s12] sm:$0xff]  ;;  %p514_p13 = pneg %p513_p12  ;;  %s515_s9 = sshll.u32 %s580_s19, 4  ;;  %s516_s9 = int_to_ptr.vmem [resolvable:$false] %s515_s9 }
  0x1b   : > { %v321_v20 = vld [vmem:[%s226_s20] sm:$0xff]  ;;  %s517_s10 = scalar_lea.vmem %s516_s9, 256  ;;  %p518_p0 = scmp.lt.s32.totalorder %s678_s29, %s516_s9 }
  0x1c   : > { %p519_p1 = scmp.lt.s32.totalorder %s517_s10, %s511_s8 }
  0x1e   : > { %p520_p2 = por %p519_p1, %p518_p0 }
  0x20   : > { %p521_p3 = pnand %p520_p2, %p514_p13 }
  0xed   : > { %v304_v6 = vpop.f32.mrb[0].mxu0 }
  0xee   : > { %308 = vadd.xlane.f32.xlu0 %v304_v6  ;;  %v458_v7 = vpop.f32.mrb[1].mxu0  ;;  %v311_v8 = vmul.f32 %v304_v6, %v304_v6 }
  0xf2   : > { %312 = vadd.xlane.f32.xlu0 %v311_v8 }
 0x17b   : > { %v309_v10 = vpop.xlane.xlu0 %308 }
 0x17c   : > { %v310_v11 = vmul.f32 0.0078125, %v309_v10 }
 0x17e   : > { %v315_v13 = vmul.f32 %v310_v11, %v310_v11 }
 0x17f   : > { %v313_v12 = vpop.xlane.xlu0 %312 }
 0x180   : > { %v314_v14 = vmul.f32 0.0078125, %v313_v12 }
 0x182   : > { %v316_v15 = vsub.f32 %v314_v14, %v315_v13 }
 0x184   : > { %v318_v16 = vadd.f32 1e-05, %v316_v15 }
 0x186   : > { %509 = vrsqrt.f32 %v318_v16 }
 0x190   : > { %v510_v18 = vpop.eup %509 }
 0x191   : > { %v320_v19 = vmul.f32 %v510_v18, %v317_v17 }
 0x193   : > { %326 = vperm.xlu1 %507, %v320_v19   ;;  %v322_v21 = vmul.f32 %v320_v19, %v310_v11 }
 0x195   : > { %v323_v22 = vsub.f32 %v321_v20, %v322_v21 }
 0x197   : > { %332 = vperm.xlu1 %507, %v323_v22  }
 0x212   : > { %v327_v23 = vpop.permute.xlu1 %326 }
 0x213   : > { %v329_v24 = vmul.f32 %v327_v23, %v304_v6 }
 0x216   : > { %v333_v25 = vpop.permute.xlu1 %332 }
 0x217   : > { %v335_v26 = vadd.f32 %v333_v25, %v329_v24 }
 0x219   : > { %v336_v27 = vmax.f32 %v335_v26, 0.0 }
 0x21b   : > { %337 = vst [vmem:[%s214_s28] sm:$0xff] %v336_v27 }
 0x21c   : > { %524 = shalt.err (!%p521_p3)
}
 0x21d   : > { %s525_s11 = scalar_lea.hbm %s676_s6, 128  ;;  %s529_s14 = scalar_lea.hbm %s722_s4, 256 }
 0x21e   : > { %p526_p4 = scmp.ne.s32.totalorder %s676_s6, %s525_s11  ;;  %p530_p9 = scmp.lt.u32.totalorder %s676_s6, %s722_s4 }
 0x21f   : > { %p531_p10 = scmp.lt.u32.totalorder %s529_s14, %s525_s11  ;;  %p533_p12 = scmp.lt.u32.totalorder %s525_s11, %s676_s6 }
 0x220   : > { %p527_p7 = pnand %p526_p4, %p644_p5 }
 0x221   : > { %p532_p11 = por %p531_p10, %p530_p9 }
 0x222   : > { %p528_p8 = pneg %p527_p7 }
 0x223   : > { %p534_p13 = por %p533_p12, %p532_p11 }
 0x225   : > { %p535_p0 = pnand %p534_p13, %p528_p8 }
 0x227   : > { %538 = shalt.err (!%p535_p0)
}
 0x228   : > { %463 = dma.vmem_to_hbm [thread:$0]  (%p644_p5), %s678_s29, 128, %s676_s6, %s339_s7  }
 0x229 PF: > { %p469_p1 = scmp.ge.s32.totalorder %s573_s18, 2  ;;  %s364_s23 = sand.u32 1, %s561_s15  }
 0x22a   : > { %s365_s27 = scalar_lea.sflag [#allocation3], %s364_s23 }
 0x22b   : > { %p466_p2 = pnand %p469_p1, %p648_p6 }
 0x22d   : > { %556 = dma.done.wait (!%p466_p2), %s365_s27, 128  }
 0x22e   : > { %558 = vsyncadd (!%p466_p2), %s365_s27, 4294967168  ;;  %p14_p3 = scmp.ge.s32.totalorder %s631_s21, 4   ;;  %s725_s15 = smov %s565_s16 }
 0x22f   : > { %s726_s16 = smov %s569_s17  ;;  %s727_s17 = smov %s642_s24 }
 0x230   : > { %s728_s18 = smov %s631_s21  ;;  %16 = sbr.rel (!%p14_p3) target bundleno = 3 (0x3), region = 77 }
 0x237   :  { %370 = vsyncpa [#allocation3], 1 }
 0x238   :  { %372 = vsyncpa [#allocation3 + $0x1], 1 }

</bundles_post_ra>
